<compile_context>
chip_gen: v7x
topology: tpu7x:2x2x1
jax: 0.10.0
libtpu: 0.0.40
codegen_flags: <defaults>
</compile_context>

<pallas_src>
import functools

import jax
import jax.numpy as jnp
from jax.experimental import pallas as pl
from jax.experimental.pallas import tpu as pltpu


def _round_up(x, m):
    return (x + m - 1) // m * m


def _recons_loss_mask_kernel(pred_ref, gt_ref, recon_out_ref, bce_out_ref, *,
                             motion_dim, recons_loss, total_rows, tile_rows):
    pid = pl.program_id(0)

    pred = pred_ref[...].astype(jnp.float32)   # (TILE_N, D)
    gt = gt_ref[...].astype(jnp.float32)       # (TILE_N, D)
    tn, d = pred.shape                         # static python ints

    # Mask / logit channels via a static lane-column slice (no full-tile selects
    # or cross-lane reductions just to read one column).
    y = gt[:, d - 1:d]      # (TILE_N, 1) gt mask channel
    x = pred[:, d - 1:d]    # (TILE_N, 1) pred mask logit

    # Row validity for the ragged last tile.  Rows past total_rows contain
    # unspecified garbage (possibly NaN/Inf), so they must be removed with a
    # select -- never by multiplying by zero.
    row = jax.lax.broadcasted_iota(jnp.int32, (tn, 1), 0) + pid * tile_rows
    row_valid = row < total_rows               # (TILE_N, 1)

    # ---- masked reconstruction term ---------------------------------------
    diff = y * (pred - gt)
    if recons_loss == 'l1':
        per_elem = jnp.abs(diff)
    elif recons_loss == 'l2':
        per_elem = diff * diff
    else:  # 'l1_smooth' -> torch.nn.SmoothL1Loss (beta = 1.0)
        adiff = jnp.abs(diff)
        per_elem = jnp.where(adiff < 1.0, 0.5 * diff * diff, adiff - 0.5)

    col = jax.lax.broadcasted_iota(jnp.int32, (tn, d), 1)
    keep = jnp.logical_and(col < motion_dim, row_valid)
    masked_rec = jnp.where(keep, per_elem, 0.0)
    # Row-direction reduce only (VPU vreg adds + one tiny sublane fold); the
    # cross-lane sum over D is deferred to plain JAX outside the kernel.
    recon_out_ref[...] = jnp.sum(masked_rec, axis=0, keepdims=True).reshape(1, 1, d)

    # ---- BCE-with-logits on the mask logit column only ---------------------
    # Stable form: max(x,0) - x*y + log1p(exp(-|x|)).
    bce = jnp.maximum(x, 0.0) - x * y + jnp.log1p(jnp.exp(-jnp.abs(x)))   # (TILE_N, 1)
    bce_masked = jnp.where(row_valid, bce, 0.0)
    bce_out_ref[...] = jnp.sum(bce_masked, axis=0, keepdims=True).reshape(1, 1, 1)


def _vmem_capacity_bytes():
    try:
        return int(pltpu.get_tpu_info().vmem_capacity_bytes)
    except Exception:
        return 64 << 20   # conservative fallback: v7x per-TensorCore VMEM


def recons_loss_mask_forward(motion_pred, motion_gt, *, nb_joints,
                             recons_loss='l1_smooth', bce_weight=1.0,
                             tile_rows=None):
    """Equivalent of ReConsLossMask(recons_loss, nb_joints).forward(pred, gt)."""
    motion_dim = (nb_joints - 1) * 12 + 4 + 3 + 4
    d = motion_pred.shape[-1]
    assert motion_gt.shape == motion_pred.shape
    assert motion_dim <= d - 1, "last dim must hold motion features plus mask channel"

    # Flatten batch/time to rows; keep the caller's dtype (bf16 stays bf16 in HBM,
    # the f32 math happens in-register inside the kernel).
    pred2 = motion_pred.reshape(-1, d)
    gt2 = motion_gt.reshape(-1, d)
    n = pred2.shape[0]

    # Only pad truly tiny inputs (< one sublane group of 8 rows); padded rows are
    # zeros and are masked out in-kernel anyway.
    n_rows = n
    if n < 8:
        pad = ((0, 8 - n), (0, 0))
        pred2 = jnp.pad(pred2, pad)
        gt2 = jnp.pad(gt2, pad)
        n_rows = 8

    # ---- generation-aware VMEM limit + tile sizing from a VMEM budget -------
    vmem_cap = _vmem_capacity_bytes()
    # ~48 MiB on v7x (64 MiB physical), ~96 MiB on v5e/v6e (128 MiB physical).
    vmem_limit = min(max(32 << 20, (vmem_cap * 3) // 4), 100 << 20)

    d_pad = _round_up(d, 128)
    itemsize = max(jnp.dtype(pred2.dtype).itemsize, 2)
    per_row_vmem = 2 * 2 * d_pad * itemsize     # 2 inputs x 2 pipeline buffers, lane-padded
    if tile_rows is None:
        data_budget = min(vmem_limit // 3, 24 << 20)
        tile_rows = max(8, data_budget // per_row_vmem)
    tr = max(8, (int(tile_rows) // 8) * 8)
    tr = min(tr, _round_up(n_rows, 8))
    num_tiles = pl.cdiv(n_rows, tr)

    kernel = functools.partial(
        _recons_loss_mask_kernel,
        motion_dim=motion_dim,
        recons_loss=recons_loss,
        total_rows=n,
        tile_rows=tr,
    )

    cost = pl.CostEstimate(
        flops=10 * n * d,
        transcendentals=2 * n,
        bytes_accessed=2 * n * d * jnp.dtype(pred2.dtype).itemsize
                       + num_tiles * (d + 1) * 4,
    )

    recon_parts, bce_parts = pl.pallas_call(
        kernel,
        out_shape=(
            jax.ShapeDtypeStruct((num_tiles, 1, d), jnp.float32),
            jax.ShapeDtypeStruct((num_tiles, 1, 1), jnp.float32),
        ),
        grid=(num_tiles,),
        in_specs=[
            pl.BlockSpec((tr, d), lambda i: (i, 0)),
            pl.BlockSpec((tr, d), lambda i: (i, 0)),
        ],
        out_specs=[
            pl.BlockSpec((1, 1, d), lambda i: (i, 0, 0)),
            pl.BlockSpec((1, 1, 1), lambda i: (i, 0, 0)),
        ],
        compiler_params=pltpu.CompilerParams(
            dimension_semantics=("parallel",),     # tiles are independent -> megacore on v7x
            vmem_limit_bytes=int(vmem_limit),
        ),
        cost_estimate=cost,
    )(pred2, gt2)

    # Tiny final reduction + normalization in plain JAX (num_tiles * (D+1) floats).
    recon_sum = jnp.sum(recon_parts)
    bce_sum = jnp.sum(bce_parts)
    return (recon_sum * (1.0 / (n * motion_dim))
            + jnp.float32(bce_weight) * bce_sum * (1.0 / n))


def _reference_forward(motion_pred, motion_gt, *, nb_joints, recons_loss='l1_smooth',
                       bce_weight=1.0):
    """Pure-JAX reference mirroring the PyTorch module (for verification)."""
    motion_dim = (nb_joints - 1) * 12 + 4 + 3 + 4
    mask = motion_gt[..., -1:]
    pred_m = mask * motion_pred[..., :-1]
    gt_m = mask * motion_gt[..., :-1]
    diff = pred_m[..., :motion_dim] - gt_m[..., :motion_dim]
    if recons_loss == 'l1':
        rec = jnp.mean(jnp.abs(diff))
    elif recons_loss == 'l2':
        rec = jnp.mean(diff * diff)
    else:
        adiff = jnp.abs(diff)
        rec = jnp.mean(jnp.where(adiff < 1.0, 0.5 * diff * diff, adiff - 0.5))
    x = motion_pred[..., -1:]
    y = motion_gt[..., -1:]
    bce = jnp.mean(jnp.maximum(x, 0.0) - x * y + jnp.log1p(jnp.exp(-jnp.abs(x))))
    return rec + bce_weight * bce


if __name__ == "__main__":
    # nb_joints=5 -> motion_dim = (5-1)*12 + 4 + 3 + 4 = 59; feature dim D = 60
    nb_joints = 5
    motion_dim = (nb_joints - 1) * 12 + 4 + 3 + 4
    D = motion_dim + 1

    key = jax.random.PRNGKey(0)
    k1, k2, k3, k4, k5, k6 = jax.random.split(key, 6)

    # Case 1: small single-tile shape (batch=2, seq=8) with auto tile sizing.
    B, T = 2, 8
    motion_pred = jax.random.normal(k1, (B, T, D), dtype=jnp.float32)
    motion_gt = jax.random.normal(k2, (B, T, D), dtype=jnp.float32)
    mask_bits = (jax.random.uniform(k3, (B, T, 1)) > 0.3).astype(jnp.float32)
    motion_gt = jnp.concatenate([motion_gt[..., :-1], mask_bits], axis=-1)

    loss = recons_loss_mask_forward(
        motion_pred, motion_gt, nb_joints=nb_joints,
        recons_loss='l1_smooth', bce_weight=1.0)
    loss = jax.block_until_ready(loss)
    ref = _reference_forward(motion_pred, motion_gt, nb_joints=nb_joints)
    assert jnp.allclose(loss, ref, atol=1e-5, rtol=1e-5), (loss, ref)

    # Case 2: multi-tile parallel grid with a ragged (unpadded) last tile
    # (N=21 rows, tile=8), exercising the in-kernel row-validity masking of both
    # the recon and BCE partials.
    B2, T2 = 3, 7
    pred2 = jax.random.normal(k4, (B2, T2, D), dtype=jnp.float32)
    gt2 = jax.random.normal(k5, (B2, T2, D), dtype=jnp.float32)
    mask2 = (jax.random.uniform(k6, (B2, T2, 1)) > 0.5).astype(jnp.float32)
    gt2 = jnp.concatenate([gt2[..., :-1], mask2], axis=-1)

    loss2 = recons_loss_mask_forward(
        pred2, gt2, nb_joints=nb_joints, recons_loss='l1_smooth',
        bce_weight=1.0, tile_rows=8)
    loss2 = jax.block_until_ready(loss2)
    ref2 = _reference_forward(pred2, gt2, nb_joints=nb_joints)
    assert jnp.allclose(loss2, ref2, atol=1e-5, rtol=1e-5), (loss2, ref2)

    print("KERNEL_OK")
</pallas_src>

<mosaic_0001>
module attributes {stable_mosaic.version = 11 : i64} {
  func.func @_recons_loss_mask_kernel(%arg0: i32, %arg1: memref<16x60xf32, #tpu.memory_space<vmem>>, %arg2: memref<16x60xf32, #tpu.memory_space<vmem>>, %arg3: memref<1x1x60xf32, #tpu.memory_space<vmem>>, %arg4: memref<1x1x1xf32, #tpu.memory_space<vmem>>) attributes {dimension_semantics = [#tpu.dimension_semantics<parallel>], iteration_bounds = array<i64: 1>, scalar_prefetch = 0 : i64, scratch_operands = 0 : i64, tpu.core_type = #tpu.core_type<tc>, window_params = [{transform_indices = @transform_0, window_bounds = array<i64: 16, 60>}, {transform_indices = @transform_1, window_bounds = array<i64: 16, 60>}, {transform_indices = @transform_2, window_bounds = array<i64: 1, 1, 60>}, {transform_indices = @transform_3, window_bounds = array<i64: 1, 1, 1>}]} {
    %c0 = arith.constant 0 : index
    %c0_0 = arith.constant 0 : index
    %0 = vector.load %arg1[%c0, %c0_0] : memref<16x60xf32, #tpu.memory_space<vmem>>, vector<16x60xf32>
    %c0_1 = arith.constant 0 : index
    %c0_2 = arith.constant 0 : index
    %1 = vector.load %arg2[%c0_1, %c0_2] : memref<16x60xf32, #tpu.memory_space<vmem>>, vector<16x60xf32>
    %2 = vector.extract_strided_slice %1 {offsets = [0, 59], sizes = [16, 1], strides = [1, 1]} : vector<16x60xf32> to vector<16x1xf32>
    %3 = vector.extract_strided_slice %0 {offsets = [0, 59], sizes = [16, 1], strides = [1, 1]} : vector<16x60xf32> to vector<16x1xf32>
    %4 = tpu.iota {dimensions = array<i32: 0>} : vector<16x1xi32>
    %c16_i32 = arith.constant 16 : i32
    %5 = arith.muli %arg0, %c16_i32 : i32
    %6 = vector.broadcast %5 : i32 to vector<16x1xi32>
    %7 = arith.addi %4, %6 : vector<16x1xi32>
    %c16_i32_3 = arith.constant 16 : i32
    %8 = vector.broadcast %c16_i32_3 : i32 to vector<16x1xi32>
    %9 = arith.cmpi slt, %7, %8 : vector<16x1xi32>
    %10 = arith.subf %0, %1 : vector<16x60xf32>
    %11 = vector.broadcast %2 : vector<16x1xf32> to vector<16x60xf32>
    %12 = arith.mulf %11, %10 : vector<16x60xf32>
    %13 = math.absf %12 : vector<16x60xf32>
    %cst = arith.constant 1.000000e+00 : f32
    %14 = vector.broadcast %cst : f32 to vector<16x60xf32>
    %15 = arith.cmpf olt, %13, %14 : vector<16x60xf32>
    %cst_4 = arith.constant 5.000000e-01 : f32
    %16 = vector.broadcast %cst_4 : f32 to vector<16x60xf32>
    %17 = arith.mulf %16, %12 : vector<16x60xf32>
    %18 = arith.mulf %17, %12 : vector<16x60xf32>
    %cst_5 = arith.constant 5.000000e-01 : f32
    %19 = vector.broadcast %cst_5 : f32 to vector<16x60xf32>
    %20 = arith.subf %13, %19 : vector<16x60xf32>
    %21 = arith.select %15, %18, %20 : vector<16x60xi1>, vector<16x60xf32>
    %22 = tpu.iota {dimensions = array<i32: 1>} : vector<16x60xi32>
    %c59_i32 = arith.constant 59 : i32
    %23 = vector.broadcast %c59_i32 : i32 to vector<16x60xi32>
    %24 = arith.cmpi slt, %22, %23 : vector<16x60xi32>
    %25 = vector.broadcast %9 : vector<16x1xi1> to vector<16x60xi1>
    %26 = arith.andi %24, %25 : vector<16x60xi1>
    %cst_6 = arith.constant 0.000000e+00 : f32
    %27 = vector.broadcast %cst_6 : f32 to vector<16x60xf32>
    %28 = arith.select %26, %21, %27 : vector<16x60xi1>, vector<16x60xf32>
    %cst_7 = arith.constant dense<0.000000e+00> : vector<60xf32>
    %29 = vector.multi_reduction <add>, %28, %cst_7 [0] : vector<16x60xf32> to vector<60xf32>
    %30 = vector.shape_cast %29 : vector<60xf32> to vector<1x60xf32>
    %31 = vector.shape_cast %30 : vector<1x60xf32> to vector<1x1x60xf32>
    %c0_8 = arith.constant 0 : index
    %c0_9 = arith.constant 0 : index
    %c0_10 = arith.constant 0 : index
    %32 = vector.load %arg3[%c0_8, %c0_9, %c0_10] : memref<1x1x60xf32, #tpu.memory_space<vmem>>, vector<1x1x60xf32>
    tpu.vector_store %arg3[%c0_8, %c0_9, %c0_10], %31 {strides = array<i32>} : memref<1x1x60xf32, #tpu.memory_space<vmem>>, vector<1x1x60xf32>,
    %cst_11 = arith.constant 0.000000e+00 : f32
    %33 = vector.broadcast %cst_11 : f32 to vector<16x1xf32>
    %34 = arith.maximumf %3, %33 : vector<16x1xf32>
    %35 = arith.mulf %3, %2 : vector<16x1xf32>
    %36 = arith.subf %34, %35 : vector<16x1xf32>
    %37 = math.absf %3 : vector<16x1xf32>
    %cst_12 = arith.constant 0.000000e+00 : f32
    %38 = vector.broadcast %cst_12 : f32 to vector<16x1xf32>
    %39 = arith.subf %38, %37 : vector<16x1xf32>
    %40 = math.exp %39 : vector<16x1xf32>
    %41 = math.log1p %40 : vector<16x1xf32>
    %42 = arith.addf %36, %41 : vector<16x1xf32>
    %cst_13 = arith.constant 0.000000e+00 : f32
    %43 = vector.broadcast %cst_13 : f32 to vector<16x1xf32>
    %44 = arith.select %9, %42, %43 : vector<16x1xi1>, vector<16x1xf32>
    %cst_14 = arith.constant dense<0.000000e+00> : vector<1xf32>
    %45 = vector.multi_reduction <add>, %44, %cst_14 [0] : vector<16x1xf32> to vector<1xf32>
    %46 = vector.shape_cast %45 : vector<1xf32> to vector<1x1xf32>
    %47 = vector.shape_cast %46 : vector<1x1xf32> to vector<1x1x1xf32>
    %c0_15 = arith.constant 0 : index
    %c0_16 = arith.constant 0 : index
    %c0_17 = arith.constant 0 : index
    %48 = vector.load %arg4[%c0_15, %c0_16, %c0_17] : memref<1x1x1xf32, #tpu.memory_space<vmem>>, vector<1x1x1xf32>
    tpu.vector_store %arg4[%c0_15, %c0_16, %c0_17], %47 {strides = array<i32>} : memref<1x1x1xf32, #tpu.memory_space<vmem>>, vector<1x1x1xf32>,
    return
  }
  func.func @transform_0(%arg0: i32) -> (i32, i32) {
    %c0_i32 = arith.constant 0 : i32
    %c0_i32_0 = arith.constant 0 : i32
    return %arg0, %c0_i32 : i32, i32
  }
  func.func @transform_1(%arg0: i32) -> (i32, i32) {
    %c0_i32 = arith.constant 0 : i32
    %c0_i32_0 = arith.constant 0 : i32
    return %arg0, %c0_i32 : i32, i32
  }
  func.func @transform_2(%arg0: i32) -> (i32, i32, i32) {
    %c0_i32 = arith.constant 0 : i32
    %c0_i32_0 = arith.constant 0 : i32
    %c0_i32_1 = arith.constant 0 : i32
    return %arg0, %c0_i32, %c0_i32_0 : i32, i32, i32
  }
  func.func @transform_3(%arg0: i32) -> (i32, i32, i32) {
    %c0_i32 = arith.constant 0 : i32
    %c0_i32_0 = arith.constant 0 : i32
    %c0_i32_1 = arith.constant 0 : i32
    return %arg0, %c0_i32, %c0_i32_0 : i32, i32, i32
  }
}

</mosaic_0001>

<bundles_post_ra>
// kernel: tpu_custom_call.1
= control target key start
LH: loop header
LB: loop body
LE: loop exit
PB: predicated region body
PF: predicated region fallthrough
CT: control target
= control target key end

     0   :  { %9 = vsyncpa [#allocation3], 0  ;;  %s391_s0 = inlined_call_operand.hbm [shape: f32[16,60], index: 0, kind: input, shape index: {}]   ;;  %s392_s1 = inlined_call_operand.hbm [shape: f32[16,60], index: 1, kind: input, shape index: {}]   ;;  %s393_s2 = inlined_call_operand.hbm [shape: f32[1,1,60], index: 2, kind: output, shape index: {0}]   ;;  %s394_s3 = inlined_call_operand.hbm [shape: f32[1,1,1], index: 3, kind: output, shape index: {1}]  }
   0x1   :  { %10 = vsyncpa [#allocation6], 0 }
   0x2   :  { %11 = vsyncpa [#allocation4], 0 }
   0x3   :  { %12 = vsyncpa [#allocation9], 0  ;;  %s302_s12 = smov [#allocation2]   ;;  %s206_s16 = scalar_lea.hbm %s391_s0, 256 }
   0x4   :  { %s18_s13 = sshll.u32 %s302_s12, 4  ;;  %p207_p0 = scmp.ne.s32.totalorder %s391_s0, %s206_s16  ;;  %s19_s13 = int_to_ptr.vmem [resolvable:$true] %s18_s13 }
   0x5   :  { %p210_p1 = scmp.lt.u32.totalorder %s206_s16, %s391_s0 }
   0x7   :  { %p212_p2 = pnand %p210_p1, %p207_p0 }
   0x9   :  { %215 = shalt.err (!%p212_p2)
}
   0xa   :  { %s216_s21 = scalar_lea.vmem %s19_s13, 256  ;;  %p221_p4 = scmp.lt.s32.totalorder %s19_s13, %s19_s13 }
   0xb   :  { %p217_p3 = scmp.ne.s32.totalorder %s19_s13, %s216_s21  ;;  %p222_p5 = scmp.lt.s32.totalorder %s216_s21, %s216_s21 }
   0xd   :  { %p223_p6 = por %p222_p5, %p221_p4 }
   0xf   :  { %p224_p7 = pnand %p223_p6, %p217_p3 }
  0x11   :  { %227 = shalt.err (!%p224_p7)
}
  0x12   :  { %s303_s22 = smov 128   ;;  %s304_s23 = smov 8  }
  0x13   :  { %24 = dma.hbm_to_vmem [thread:$0]  %s391_s0, 256, %s19_s13, [#allocation3], %s303_s22, %s303_s22, %s304_s23  }
  0x14   :  { %s305_s26 = smov [#allocation5]   ;;  %s228_s30 = scalar_lea.hbm %s392_s1, 256 }
  0x15   :  { %s30_s27 = sshll.u32 %s305_s26, 4  ;;  %p229_p8 = scmp.ne.s32.totalorder %s392_s1, %s228_s30  ;;  %s31_s27 = int_to_ptr.vmem [resolvable:$true] %s30_s27 }
  0x16   :  { %p232_p9 = scmp.lt.u32.totalorder %s228_s30, %s392_s1 }
  0x18   :  { %p234_p10 = pnand %p232_p9, %p229_p8 }
  0x1a   :  { %237 = shalt.err (!%p234_p10)
}
  0x1b   :  { %s238_s8 = scalar_lea.vmem %s31_s27, 256  ;;  %p243_p12 = scmp.lt.s32.totalorder %s31_s27, %s31_s27 }
  0x1c   :  { %p239_p11 = scmp.ne.s32.totalorder %s31_s27, %s238_s8  ;;  %p244_p13 = scmp.lt.s32.totalorder %s238_s8, %s238_s8 }
  0x1e   :  { %p245_p0 = por %p244_p13, %p243_p12 }
  0x20   :  { %p246_p1 = pnand %p245_p0, %p239_p11 }
  0x22   :  { %249 = shalt.err (!%p246_p1)
}
  0x23   :  { %36 = dma.hbm_to_vmem [thread:$0]  %s392_s1, 256, %s31_s27, [#allocation6], %s303_s22, %s303_s22, %s304_s23  }
  0x24   :  { %294 = dma.done.wait [#allocation3], 256  }
  0x25   :  { %295 = vsyncadd [#allocation3], 4294967040 }
  0x26   :  { %296 = dma.done.wait [#allocation6], 256  }
  0x27   :  { %297 = vsyncadd [#allocation6], 4294967040  ;;  %v306_v0 = vmov 59   ;;  %v45_v1 = vld [vmem:[#allocation5] sm:$0xff]  ;;  %v43_v2 = vld [vmem:[#allocation2] sm:$0xff]  ;;  %vm141_vm2 = vcmask 490968   ;;  %v82_v48 = vlaneseq }
  0x28   :  { %197 = vset.pattern.permute.xlu0 %v306_v0  ;;  %v111_v3 = vand.u32 2147483647, %v43_v2  ;;  %v354_v4 = vld [vmem:[#allocation2 + $0x8] sm:$0xff]  ;;  %v56_v5 = vsub.f32 %v43_v2, %v45_v1  ;;  %v356_v6 = vld [vmem:[#allocation5 + $0x8] sm:$0xff]  ;;  %v105_v20 = vmax.f32 %v43_v2, 0.0  ;;  %v107_v21 = vmul.f32 %v45_v1, %v43_v2  ;;  %s307_s1 = smov 69  }
  0x29   :  { %60 = vperm.xlu0 %197, %v45_v1   ;;  %v112_v7 = vand.u32 2147483647, %v354_v4  ;;  %v57_v10 = vsub.f32 %v354_v4, %v356_v6  ;;  %v106_v24 = vmax.f32 %v354_v4, 0.0  ;;  %v108_v25 = vmul.f32 %v356_v6, %v354_v4  ;;  %s308_s10 = smov [#allocation7]  }
  0x2a   :  { %v113_v8 = vsub.f32 0.0, %v111_v3  ;;  %v109_v29 = vsub.f32 %v105_v20, %v107_v21  ;;  %v83_v49 = vand.u32 127, %v82_v48  ;;  %vm93_vm5 = vcmask 490496   ;;  %s163_s11 = sshll.u32 %s308_s10, 4  ;;  %s164_s11 = int_to_ptr.vmem [resolvable:$true] %s163_s11 }
  0x2b   :  { %v114_v9 = vsub.f32 0.0, %v112_v7  ;;  %v110_v33 = vsub.f32 %v106_v24, %v108_v25  ;;  %vm103_vm7 = vcmask 483328   ;;  %s250_s12 = scalar_lea.vmem %s164_s11, 16  ;;  %s254_s13 = scalar_lea.vmem %s164_s11, 32 }
  0x2c   :  { %v115_v11 = vmul.f32 1.442695, %v113_v8  ;;  %vm84_vm3 = vcmp.lt.s32.totalorder %v83_v49, 59  ;;  %p251_p2 = scmp.ne.s32.totalorder %s164_s11, %s250_s12  ;;  %p255_p3 = scmp.lt.s32.totalorder %s164_s11, %s164_s11 }
  0x2d   :  { %65 = vperm.xlu0 %197, %v356_v6   ;;  %v117_v12 = vmul.f32 1.442695, %v114_v9  ;;  %p256_p4 = scmp.lt.s32.totalorder %s254_s13, %s250_s12 }
  0x2e   :  { %198 = vpow2.f32 %v115_v11 }
  0x2f   :  { %200 = vpow2.f32 %v117_v12  ;;  %p257_p5 = por %p256_p4, %p255_p3 }
  0x31   :  { %p258_p6 = pnand %p257_p5, %p251_p2 }
  0x38   :  { %v199_v13 = vpop.eup %198 }
  0x39   :  { %v201_v14 = vpop.eup %200  ;;  %v119_v15 = vadd.f32 1.0, %v199_v13  ;;  %v122_v17 = vmul.f32 -0.5, %v199_v13  ;;  %v125_v22 = vand.u32 2147483647, %v199_v13 }
  0x3a   :  { %v128_v16 = vadd.f32 1.0, %v201_v14  ;;  %v131_v18 = vmul.f32 -0.5, %v201_v14  ;;  %v134_v26 = vand.u32 2147483647, %v201_v14 }
  0x3b   :  { %202 = vlog2.f32 %v119_v15  ;;  %v123_v19 = vadd.f32 1.0, %v122_v17  ;;  %vm126_vm0 = vcmp.lt.f32.partialorder %v125_v22, 0.0004427343 }
  0x3c   :  { %204 = vlog2.f32 %v128_v16  ;;  %v132_v23 = vadd.f32 1.0, %v131_v18  ;;  %vm135_vm1 = vcmp.lt.f32.partialorder %v134_v26, 0.0004427343 }
  0x3d   :  { %v124_v27 = vmul.f32 %v199_v13, %v123_v19 }
  0x3e   :  { %v133_v30 = vmul.f32 %v201_v14, %v132_v23 }
  0x45   :  { %v203_v28 = vpop.eup %202 }
  0x46   :  { %v205_v31 = vpop.eup %204  ;;  %v121_v32 = vmul.f32 0.6931472, %v203_v28 }
  0x47   :  { %v130_v34 = vmul.f32 0.6931472, %v205_v31 }
  0x48   :  { %v127_v35 = vsel %vm126_vm0, %v124_v27, %v121_v32 }
  0x49   :  { %v137_v36 = vadd.f32 %v127_v35, %v109_v29  ;;  %v136_v37 = vsel %vm135_vm1, %v133_v30, %v130_v34 }
  0x4a   :  { %v138_v38 = vadd.f32 %v136_v37, %v110_v33 }
  0x4b   :  { %v142_v39 = vsel %vm141_vm2, %v137_v36, 0.0 }
  0x4c   :  { %v143_v40 = vsel %vm141_vm2, %v138_v38, 0.0 }
  0x4d   :  { %v144_v41 = vadd.f32 %v143_v40, %v142_v39 }
  0x4f   :  { %v145_v42 = vrot.slane %v144_v41, 4 }
  0x51   :  { %v146_v43 = vadd.f32 %v145_v42, %v144_v41 }
  0x53   :  { %v147_v44 = vrot.slane %v146_v43, 2 }
  0x55   :  { %v148_v45 = vadd.f32 %v147_v44, %v146_v43 }
  0x57   :  { %v149_v46 = vrot.slane %v148_v45, 1 }
  0x59   :  { %v150_v47 = vadd.f32 %v149_v46, %v148_v45 }
  0x5b   :  { %152 = vrot.lane.b32.xlu1 %v150_v47, %s307_s1 }
  0xa8   :  { %v61_v50 = vpop.permute.xlu0 %60 }
  0xa9   :  { %v68_v51 = vmul.f32 %v61_v50, %v56_v5 }
  0xab   :  { %v70_v52 = vand.u32 2147483647, %v68_v51  ;;  %v74_v53 = vmul.f32 0.5, %v68_v51 }
  0xac   :  { %v66_v54 = vpop.permute.xlu0 %65 }
  0xad   :  { %vm72_vm4 = vcmp.lt.f32.partialorder %v70_v52, 1.0  ;;  %v76_v55 = vmul.f32 %v74_v53, %v68_v51  ;;  %v187_v56 = vadd.f32 -0.5, %v70_v52  ;;  %v69_v57 = vmul.f32 %v66_v54, %v57_v10 }
  0xaf   :  { %v80_v58 = vsel %vm72_vm4, %v76_v55, %v187_v56  ;;  %v71_v59 = vand.u32 2147483647, %v69_v57  ;;  %v75_v60 = vmul.f32 0.5, %v69_v57 }
  0xb0   :  { %v91_v61 = vsel %vm84_vm3, %v80_v58, 0.0 }
  0xb1   :  { %vm73_vm6 = vcmp.lt.f32.partialorder %v71_v59, 1.0  ;;  %v77_v62 = vmul.f32 %v75_v60, %v69_v57  ;;  %v188_v63 = vadd.f32 -0.5, %v71_v59  ;;  %v94_v0 = vsel %vm93_vm5, %v91_v61, 0.0 }
  0xb3   :  { %v81_v1 = vsel %vm73_vm6, %v77_v62, %v188_v63 }
  0xb4   :  { %v92_v2 = vsel %vm84_vm3, %v81_v1, 0.0 }
  0xb5   :  { %v95_v3 = vsel %vm93_vm5, %v92_v2, 0.0 }
  0xb6   :  { %v96_v4 = vadd.f32 %v95_v3, %v94_v0 }
  0xb8   :  { %v97_v5 = vrot.slane %v96_v4, 4 }
  0xba   :  { %v98_v6 = vadd.f32 %v97_v5, %v96_v4 }
  0xbc   :  { %v99_v7 = vrot.slane %v98_v6, 2 }
  0xbe   :  { %v100_v8 = vadd.f32 %v99_v7, %v98_v6 }
  0xc0   :  { %v101_v9 = vrot.slane %v100_v8, 1 }
  0xc2   :  { %v102_v10 = vadd.f32 %v101_v9, %v100_v8 }
  0xc4   :  { %104 = vst.msk [vmem:[#allocation7] sm:$0x1] %vm103_vm7, %v102_v10 }
  0xc5   :  { %261 = shalt.err (!%p258_p6)
}
  0xc6   :  { %s262_s16 = scalar_lea.hbm %s393_s2, 16 }
  0xc7   :  { %p263_p7 = scmp.ne.s32.totalorder %s393_s2, %s262_s16  ;;  %p266_p8 = scmp.lt.u32.totalorder %s262_s16, %s393_s2 }
  0xc9   :  { %p268_p9 = pnand %p266_p8, %p263_p7 }
  0xcb   :  { %271 = shalt.err (!%p268_p9)
}
  0xcc   :  { %166 = dma.vmem_to_hbm [thread:$0]  %s164_s11, 16, %s393_s2, [#allocation4]   ;;  %vm155_vm8 = vcmask 0  }
  0xcd   :  { %s309_s23 = smov [#allocation8]   ;;  %v153_v11 = vpop.permute.xlu1 %152 }
  0xce   :  { %s173_s24 = sshll.u32 %s309_s23, 4  ;;  %156 = vst.msk [vmem:[#allocation8] sm:$0x1] %vm155_vm8, %v153_v11  ;;  %s174_s24 = int_to_ptr.vmem [resolvable:$true] %s173_s24 }
  0xcf   :  { %s272_s25 = scalar_lea.vmem %s174_s24, 16  ;;  %s276_s26 = scalar_lea.vmem %s174_s24, 32 }
  0xd0   :  { %p273_p10 = scmp.ne.s32.totalorder %s174_s24, %s272_s25  ;;  %p277_p11 = scmp.lt.s32.totalorder %s174_s24, %s174_s24 }
  0xd1   :  { %p278_p12 = scmp.lt.s32.totalorder %s276_s26, %s272_s25 }
  0xd3   :  { %p279_p13 = por %p278_p12, %p277_p11 }
  0xd5   :  { %p280_p0 = pnand %p279_p13, %p273_p10 }
  0xd7   :  { %283 = shalt.err (!%p280_p0)
}
  0xd8   :  { %s284_s29 = scalar_lea.hbm %s394_s3, 16 }
  0xd9   :  { %p285_p1 = scmp.ne.s32.totalorder %s394_s3, %s284_s29  ;;  %p288_p2 = scmp.lt.u32.totalorder %s284_s29, %s394_s3 }
  0xdb   :  { %p290_p3 = pnand %p288_p2, %p285_p1 }
  0xdd   :  { %293 = shalt.err (!%p290_p3)
}
  0xde   :  { %176 = dma.vmem_to_hbm [thread:$0]  %s174_s24, 16, %s394_s3, [#allocation9]  }
  0xdf   :  { %298 = dma.done.wait [#allocation4], 16  }
  0xe0   :  { %299 = vsyncadd [#allocation4], 4294967280 }
  0xe1   :  { %300 = dma.done.wait [#allocation9], 16  }
  0xe2   :  { %301 = vsyncadd [#allocation9], 4294967280 }
  0xe3   :  { %183 = vsyncpa [#allocation3], 1 }
  0xe4   :  { %184 = vsyncpa [#allocation6], 1 }
  0xe5   :  { %185 = vsyncpa [#allocation4], 1 }
  0xe6   :  { %186 = vsyncpa [#allocation9], 1 }

</bundles_post_ra>
